<compile_context>
chip_gen: v6e
topology: v6e:2x2x1
jax: 0.10.0
libtpu: 0.0.40
codegen_flags: <defaults>
</compile_context>

<pallas_src>
import functools

import jax
import jax.numpy as jnp
from jax import lax
from jax.experimental import pallas as pl
from jax.experimental.pallas import tpu as pltpu


# ----------------------------------------------------------------------------- kernels
def _attention_head(q, k, v):
    """One scaled-dot-product attention head.

    q/k/v: bf16 (seq, d); qk_scale is already folded into q (via the Q weight columns).
    Returns f32 (seq, dim_single_v).
    """
    # q @ k^T without materializing the transpose: contract the last dims.
    s = lax.dot_general(q, k, dimension_numbers=(((1,), (1,)), ((), ())),
                        preferred_element_type=jnp.float32)
    # Numerically-stable softmax over the last axis (matches torch.nn.Softmax(-1)).
    s = s - jnp.max(s, axis=-1, keepdims=True)
    p = jnp.exp(s)
    p = p * pl.reciprocal(jnp.sum(p, axis=-1, keepdims=True), approx=True)
    return jnp.dot(p.astype(jnp.bfloat16), v, preferred_element_type=jnp.float32)


def _mha_kernel(x_ref, w_qkv_ref, wout_ref, bout_ref, o_ref, *,
                batch, seq, num_heads, dim_single_qk, dim_single_v):
    # x_ref:     (B*N, dim_token)                  bf16
    # w_qkv_ref: (dim_token, H*(2*dqk+dv))         bf16  [Wq|Wk|Wv], qk_scale folded in Wq
    # wout_ref:  (H*dv, dim_out)                   bf16
    # bout_ref:  (1, dim_out)                      f32
    # o_ref:     (B*N, dim_out)                    f32
    dqk, dv = dim_single_qk, dim_single_v
    hq = num_heads * dqk

    # Single fused QKV projection for the whole batch; keep the result f32 so the
    # 8-row batch slices below are sublane-tile aligned (no packed-bf16 splits).
    qkv = jnp.dot(x_ref[...], w_qkv_ref[...], preferred_element_type=jnp.float32)

    row_blocks = []
    for b in range(batch):                       # static unroll (B is small)
        r0 = b * seq
        heads = []
        for h in range(num_heads):               # static unroll over heads
            q = qkv[r0:r0 + seq, h * dqk:(h + 1) * dqk].astype(jnp.bfloat16)
            k = qkv[r0:r0 + seq, hq + h * dqk:hq + (h + 1) * dqk].astype(jnp.bfloat16)
            v = qkv[r0:r0 + seq, 2 * hq + h * dv:2 * hq + (h + 1) * dv].astype(jnp.bfloat16)
            heads.append(_attention_head(q, k, v))          # (seq, dv) f32
        row_blocks.append(jnp.concatenate(heads, axis=-1))  # (seq, H*dv) f32

    concat = jnp.concatenate(row_blocks, axis=0)             # (B*N, H*dv) f32
    # One fused output projection for all heads and all batches; bias added once.
    out = jnp.dot(concat.astype(jnp.bfloat16), wout_ref[...],
                  preferred_element_type=jnp.float32)
    o_ref[...] = (out + bout_ref[...]).astype(o_ref.dtype)   # single full store


def _sdpa_kernel(x_ref, w_qkv_ref, o_ref, *, batch, seq, dim_single_qk, dim_single_v):
    # num_heads == 1: to_out is Identity, so w_out / b_out are never passed or DMA'd.
    dqk, dv = dim_single_qk, dim_single_v
    qkv = jnp.dot(x_ref[...], w_qkv_ref[...], preferred_element_type=jnp.float32)
    row_blocks = []
    for b in range(batch):
        r0 = b * seq
        q = qkv[r0:r0 + seq, 0:dqk].astype(jnp.bfloat16)
        k = qkv[r0:r0 + seq, dqk:2 * dqk].astype(jnp.bfloat16)
        v = qkv[r0:r0 + seq, 2 * dqk:2 * dqk + dv].astype(jnp.bfloat16)
        row_blocks.append(_attention_head(q, k, v))           # (seq, dv) f32
    o_ref[...] = jnp.concatenate(row_blocks, axis=0).astype(o_ref.dtype)


# ------------------------------------------------------------------- one-time packing
def pack_mha_params(w_qkv, w_out, b_out, *, num_heads, dim_single_qk, dim_single_v):
    """One-time (model-init) weight packing.  Call OUTSIDE the per-step hot path.

    Re-packs the PyTorch to_qkv weight (H*dim_single_head, dim_token), whose rows are
    [q|k|v] interleaved per head, into a single head-major, pre-transposed bf16 slab
    [Wq | Wk | Wv] of shape (dim_token, H*(2*dqk+dv)); qk_scale is folded into Wq.
    Also pre-transposes / casts w_out and reshapes b_out.
    """
    dqk, dv = dim_single_qk, dim_single_v
    dim_token = w_qkv.shape[1]
    dsh = 2 * dqk + dv
    qk_scale = dqk ** (-0.5)

    w3 = jnp.asarray(w_qkv, jnp.float32).reshape(num_heads, dsh, dim_token)
    wq = w3[:, :dqk, :].reshape(num_heads * dqk, dim_token) * qk_scale  # scale folded in
    wk = w3[:, dqk:2 * dqk, :].reshape(num_heads * dqk, dim_token)
    wv = w3[:, 2 * dqk:, :].reshape(num_heads * dv, dim_token)
    w_fused = jnp.concatenate([wq, wk, wv], axis=0).T.astype(jnp.bfloat16)

    if num_heads == 1:
        return (w_fused,)

    wout_t = jnp.asarray(w_out, jnp.float32).T.astype(jnp.bfloat16)     # (H*dv, dim_out)
    bout_2d = jnp.asarray(b_out, jnp.float32)[None, :]                  # (1, dim_out) f32
    return (w_fused, wout_t, bout_2d)


# ------------------------------------------------------------------------ hot wrapper
def multi_head_attention(x, packed_params, *,
                         num_heads, dim_single_qk, dim_single_v, dim_out):
    """
    x:             (B, N, dim_token) float32
    packed_params: output of pack_mha_params()
    returns (B, N, dim_out) f32  (dim_out == dim_single_v when num_heads == 1)
    """
    B, N, dim_token = x.shape
    x2d = jnp.asarray(x, jnp.float32).reshape(B * N, dim_token).astype(jnp.bfloat16)

    def full2d(shape):
        return pl.BlockSpec(shape, lambda i: (0, 0))

    if num_heads == 1:
        assert dim_single_v == dim_out, "num_heads == 1 requires dim_out == dim_single_v"
        (w_fused,) = packed_params
        out_dim = dim_single_v
        kernel = functools.partial(_sdpa_kernel, batch=B, seq=N,
                                   dim_single_qk=dim_single_qk,
                                   dim_single_v=dim_single_v)
        out2d = pl.pallas_call(
            kernel,
            out_shape=jax.ShapeDtypeStruct((B * N, out_dim), jnp.float32),
            grid_spec=pltpu.PrefetchScalarGridSpec(
                num_scalar_prefetch=0,
                grid=(1,),
                in_specs=[full2d(x2d.shape), full2d(w_fused.shape)],
                out_specs=full2d((B * N, out_dim))),
            compiler_params=pltpu.CompilerParams(
                dimension_semantics=("arbitrary",)),
        )(x2d, w_fused)
    else:
        w_fused, wout_t, bout_2d = packed_params
        out_dim = dim_out
        kernel = functools.partial(_mha_kernel, batch=B, seq=N,
                                   num_heads=num_heads,
                                   dim_single_qk=dim_single_qk,
                                   dim_single_v=dim_single_v)
        out2d = pl.pallas_call(
            kernel,
            out_shape=jax.ShapeDtypeStruct((B * N, out_dim), jnp.float32),
            grid_spec=pltpu.PrefetchScalarGridSpec(
                num_scalar_prefetch=0,
                grid=(1,),
                in_specs=[full2d(x2d.shape), full2d(w_fused.shape),
                          full2d(wout_t.shape), full2d(bout_2d.shape)],
                out_specs=full2d((B * N, out_dim))),
            compiler_params=pltpu.CompilerParams(
                dimension_semantics=("arbitrary",)),
        )(x2d, w_fused, wout_t, bout_2d)

    return out2d.reshape(B, N, out_dim)


# --------------------------------------------------------------------------- reference
def _reference(x, w_qkv, w_out, b_out, *, num_heads, dim_single_qk, dim_single_v):
    """Pure-JAX f32 replica of the PyTorch forward for verification."""
    dsh = 2 * dim_single_qk + dim_single_v
    qk_scale = dim_single_qk ** (-0.5)
    all_qkv = jnp.einsum('bnd,od->bno', x, w_qkv)
    heads = []
    for h in range(num_heads):
        off = h * dsh
        q = all_qkv[:, :, off:off + dim_single_qk]
        k = all_qkv[:, :, off + dim_single_qk:off + 2 * dim_single_qk]
        v = all_qkv[:, :, off + 2 * dim_single_qk:off + dsh]
        s = jnp.einsum('bqd,bkd->bqk', q, k) * qk_scale
        s = jax.nn.softmax(s, axis=-1)
        heads.append(jnp.einsum('bqk,bkd->bqd', s, v))
    concat = jnp.concatenate(heads, axis=-1)
    if num_heads != 1:
        return jnp.einsum('bnv,ov->bno', concat, w_out) + b_out
    return concat


if __name__ == "__main__":
    key = jax.random.PRNGKey(0)
    kx, kw1, kw2, kb2, kx1, kw3 = jax.random.split(key, 6)

    # ------------------------------------------------------------------ multi-head
    B, N = 2, 8
    dim_token, dim_single_qk, dim_single_v, dim_out, num_heads = 32, 16, 16, 32, 4
    dim_single_head = 2 * dim_single_qk + dim_single_v

    x = jax.random.normal(kx, (B, N, dim_token), dtype=jnp.float32)
    bound_qkv = 1.0 / (dim_token ** 0.5)
    w_qkv = jax.random.uniform(kw1, (dim_single_head * num_heads, dim_token),
                               minval=-bound_qkv, maxval=bound_qkv, dtype=jnp.float32)
    bound_out = 1.0 / ((dim_single_v * num_heads) ** 0.5)
    w_out = jax.random.uniform(kw2, (dim_out, dim_single_v * num_heads),
                               minval=-bound_out, maxval=bound_out, dtype=jnp.float32)
    b_out = jax.random.uniform(kb2, (dim_out,),
                               minval=-bound_out, maxval=bound_out, dtype=jnp.float32)

    # One-time weight packing (init-time), outside the hot path.
    packed = pack_mha_params(w_qkv, w_out, b_out,
                             num_heads=num_heads, dim_single_qk=dim_single_qk,
                             dim_single_v=dim_single_v)
    packed = jax.block_until_ready(packed)

    out = multi_head_attention(
        x, packed,
        num_heads=num_heads, dim_single_qk=dim_single_qk,
        dim_single_v=dim_single_v, dim_out=dim_out)
    out = jax.block_until_ready(out)

    ref = _reference(x, w_qkv, w_out, b_out,
                     num_heads=num_heads, dim_single_qk=dim_single_qk,
                     dim_single_v=dim_single_v)
    assert out.shape == (B, N, dim_out), out.shape
    # bf16 MXU operands vs. a pure-f32 reference -> loosened tolerance.
    assert jnp.allclose(out, ref, atol=3e-2, rtol=3e-2), "mismatch vs reference (multi-head)"

    # ------------------------------------------------------ single-head (to_out == Identity)
    dqk1, dv1, dout1 = 16, 32, 32
    dsh1 = 2 * dqk1 + dv1
    x1 = jax.random.normal(kx1, (B, N, dim_token), dtype=jnp.float32)
    w_qkv1 = jax.random.uniform(kw3, (dsh1, dim_token),
                                minval=-bound_qkv, maxval=bound_qkv, dtype=jnp.float32)

    packed1 = pack_mha_params(w_qkv1, None, None,
                              num_heads=1, dim_single_qk=dqk1, dim_single_v=dv1)
    packed1 = jax.block_until_ready(packed1)

    out1 = multi_head_attention(
        x1, packed1,
        num_heads=1, dim_single_qk=dqk1, dim_single_v=dv1, dim_out=dout1)
    out1 = jax.block_until_ready(out1)

    ref1 = _reference(x1, w_qkv1, None, None,
                      num_heads=1, dim_single_qk=dqk1, dim_single_v=dv1)
    assert out1.shape == (B, N, dv1), out1.shape
    assert jnp.allclose(out1, ref1, atol=3e-2, rtol=3e-2), "mismatch vs reference (single-head)"

    # TODO(synk): dropout (p=0, eval) is an identity and intentionally not implemented.
    print("KERNEL_OK")
</pallas_src>

<mosaic_0001>
module attributes {stable_mosaic.version = 11 : i64} {
  func.func @_mha_kernel(%arg0: i32, %arg1: memref<16x32xbf16, #tpu.memory_space<vmem>>, %arg2: memref<32x192xbf16, #tpu.memory_space<vmem>>, %arg3: memref<64x32xbf16, #tpu.memory_space<vmem>>, %arg4: memref<1x32xf32, #tpu.memory_space<vmem>>, %arg5: memref<16x32xf32, #tpu.memory_space<vmem>>) attributes {dimension_semantics = [#tpu.dimension_semantics<arbitrary>], iteration_bounds = array<i64: 1>, scalar_prefetch = 0 : i64, scratch_operands = 0 : i64, tpu.core_type = #tpu.core_type<tc>, window_params = [{pipeline_mode = #tpu.pipeline_mode<synchronous>, transform_indices = @transform_0, window_bounds = array<i64: 16, 32>}, {pipeline_mode = #tpu.pipeline_mode<synchronous>, transform_indices = @transform_1, window_bounds = array<i64: 32, 192>}, {pipeline_mode = #tpu.pipeline_mode<synchronous>, transform_indices = @transform_2, window_bounds = array<i64: 64, 32>}, {pipeline_mode = #tpu.pipeline_mode<synchronous>, transform_indices = @transform_3, window_bounds = array<i64: 1, 32>}, {pipeline_mode = #tpu.pipeline_mode<synchronous>, transform_indices = @transform_4, window_bounds = array<i64: 16, 32>}]} {
    %c0 = arith.constant 0 : index
    %c0_0 = arith.constant 0 : index
    %0 = vector.load %arg1[%c0, %c0_0] : memref<16x32xbf16, #tpu.memory_space<vmem>>, vector<16x32xbf16>
    %c0_1 = arith.constant 0 : index
    %c0_2 = arith.constant 0 : index
    %1 = vector.load %arg2[%c0_1, %c0_2] : memref<32x192xbf16, #tpu.memory_space<vmem>>, vector<32x192xbf16>
    %cst = arith.constant dense<0.000000e+00> : vector<16x192xf32>
    %2 = tpu.matmul %0, %1, %cst {dimension_numbers = #tpu.dot_dimension_numbers<[1], [0], [0], [1], [0, 0, 1, 1], [], []>} : vector<16x32xbf16>, vector<32x192xbf16>, vector<16x192xf32> -> vector<16x192xf32>
    %3 = vector.extract_strided_slice %2 {offsets = [0, 0], sizes = [8, 16], strides = [1, 1]} : vector<16x192xf32> to vector<8x16xf32>
    %4 = arith.truncf %3 : vector<8x16xf32> to vector<8x16xbf16>
    %5 = vector.extract_strided_slice %2 {offsets = [0, 64], sizes = [8, 16], strides = [1, 1]} : vector<16x192xf32> to vector<8x16xf32>
    %6 = arith.truncf %5 : vector<8x16xf32> to vector<8x16xbf16>
    %7 = vector.extract_strided_slice %2 {offsets = [0, 128], sizes = [8, 16], strides = [1, 1]} : vector<16x192xf32> to vector<8x16xf32>
    %8 = arith.truncf %7 : vector<8x16xf32> to vector<8x16xbf16>
    %cst_3 = arith.constant dense<0.000000e+00> : vector<8x8xf32>
    %9 = tpu.matmul %4, %6, %cst_3 {dimension_numbers = #tpu.dot_dimension_numbers<[1], [1], [0], [0], [0, 0, 1, 0], [], []>} : vector<8x16xbf16>, vector<8x16xbf16>, vector<8x8xf32> -> vector<8x8xf32>
    %cst_4 = arith.constant dense<0xFF800000> : vector<8xf32>
    %10 = vector.multi_reduction <maximumf>, %9, %cst_4 [1] : vector<8x8xf32> to vector<8xf32>
    %11 = vector.shape_cast %10 : vector<8xf32> to vector<8x1xf32>
    %12 = vector.broadcast %11 : vector<8x1xf32> to vector<8x8xf32>
    %13 = arith.subf %9, %12 : vector<8x8xf32>
    %14 = math.exp %13 : vector<8x8xf32>
    %cst_5 = arith.constant dense<0.000000e+00> : vector<8xf32>
    %15 = vector.multi_reduction <add>, %14, %cst_5 [1] : vector<8x8xf32> to vector<8xf32>
    %16 = vector.shape_cast %15 : vector<8xf32> to vector<8x1xf32>
    %17 = tpu.reciprocal %16 {approx = true} : vector<8x1xf32> -> vector<8x1xf32>
    %18 = vector.broadcast %17 : vector<8x1xf32> to vector<8x8xf32>
    %19 = arith.mulf %14, %18 : vector<8x8xf32>
    %20 = arith.truncf %19 : vector<8x8xf32> to vector<8x8xbf16>
    %cst_6 = arith.constant dense<0.000000e+00> : vector<8x16xf32>
    %21 = tpu.matmul %20, %8, %cst_6 {dimension_numbers = #tpu.dot_dimension_numbers<[1], [0], [0], [1], [0, 0, 1, 1], [], []>} : vector<8x8xbf16>, vector<8x16xbf16>, vector<8x16xf32> -> vector<8x16xf32>
    %22 = vector.extract_strided_slice %2 {offsets = [0, 16], sizes = [8, 16], strides = [1, 1]} : vector<16x192xf32> to vector<8x16xf32>
    %23 = arith.truncf %22 : vector<8x16xf32> to vector<8x16xbf16>
    %24 = vector.extract_strided_slice %2 {offsets = [0, 80], sizes = [8, 16], strides = [1, 1]} : vector<16x192xf32> to vector<8x16xf32>
    %25 = arith.truncf %24 : vector<8x16xf32> to vector<8x16xbf16>
    %26 = vector.extract_strided_slice %2 {offsets = [0, 144], sizes = [8, 16], strides = [1, 1]} : vector<16x192xf32> to vector<8x16xf32>
    %27 = arith.truncf %26 : vector<8x16xf32> to vector<8x16xbf16>
    %cst_7 = arith.constant dense<0.000000e+00> : vector<8x8xf32>
    %28 = tpu.matmul %23, %25, %cst_7 {dimension_numbers = #tpu.dot_dimension_numbers<[1], [1], [0], [0], [0, 0, 1, 0], [], []>} : vector<8x16xbf16>, vector<8x16xbf16>, vector<8x8xf32> -> vector<8x8xf32>
    %cst_8 = arith.constant dense<0xFF800000> : vector<8xf32>
    %29 = vector.multi_reduction <maximumf>, %28, %cst_8 [1] : vector<8x8xf32> to vector<8xf32>
    %30 = vector.shape_cast %29 : vector<8xf32> to vector<8x1xf32>
    %31 = vector.broadcast %30 : vector<8x1xf32> to vector<8x8xf32>
    %32 = arith.subf %28, %31 : vector<8x8xf32>
    %33 = math.exp %32 : vector<8x8xf32>
    %cst_9 = arith.constant dense<0.000000e+00> : vector<8xf32>
    %34 = vector.multi_reduction <add>, %33, %cst_9 [1] : vector<8x8xf32> to vector<8xf32>
    %35 = vector.shape_cast %34 : vector<8xf32> to vector<8x1xf32>
    %36 = tpu.reciprocal %35 {approx = true} : vector<8x1xf32> -> vector<8x1xf32>
    %37 = vector.broadcast %36 : vector<8x1xf32> to vector<8x8xf32>
    %38 = arith.mulf %33, %37 : vector<8x8xf32>
    %39 = arith.truncf %38 : vector<8x8xf32> to vector<8x8xbf16>
    %cst_10 = arith.constant dense<0.000000e+00> : vector<8x16xf32>
    %40 = tpu.matmul %39, %27, %cst_10 {dimension_numbers = #tpu.dot_dimension_numbers<[1], [0], [0], [1], [0, 0, 1, 1], [], []>} : vector<8x8xbf16>, vector<8x16xbf16>, vector<8x16xf32> -> vector<8x16xf32>
    %41 = vector.extract_strided_slice %2 {offsets = [0, 32], sizes = [8, 16], strides = [1, 1]} : vector<16x192xf32> to vector<8x16xf32>
    %42 = arith.truncf %41 : vector<8x16xf32> to vector<8x16xbf16>
    %43 = vector.extract_strided_slice %2 {offsets = [0, 96], sizes = [8, 16], strides = [1, 1]} : vector<16x192xf32> to vector<8x16xf32>
    %44 = arith.truncf %43 : vector<8x16xf32> to vector<8x16xbf16>
    %45 = vector.extract_strided_slice %2 {offsets = [0, 160], sizes = [8, 16], strides = [1, 1]} : vector<16x192xf32> to vector<8x16xf32>
    %46 = arith.truncf %45 : vector<8x16xf32> to vector<8x16xbf16>
    %cst_11 = arith.constant dense<0.000000e+00> : vector<8x8xf32>
    %47 = tpu.matmul %42, %44, %cst_11 {dimension_numbers = #tpu.dot_dimension_numbers<[1], [1], [0], [0], [0, 0, 1, 0], [], []>} : vector<8x16xbf16>, vector<8x16xbf16>, vector<8x8xf32> -> vector<8x8xf32>
    %cst_12 = arith.constant dense<0xFF800000> : vector<8xf32>
    %48 = vector.multi_reduction <maximumf>, %47, %cst_12 [1] : vector<8x8xf32> to vector<8xf32>
    %49 = vector.shape_cast %48 : vector<8xf32> to vector<8x1xf32>
    %50 = vector.broadcast %49 : vector<8x1xf32> to vector<8x8xf32>
    %51 = arith.subf %47, %50 : vector<8x8xf32>
    %52 = math.exp %51 : vector<8x8xf32>
    %cst_13 = arith.constant dense<0.000000e+00> : vector<8xf32>
    %53 = vector.multi_reduction <add>, %52, %cst_13 [1] : vector<8x8xf32> to vector<8xf32>
    %54 = vector.shape_cast %53 : vector<8xf32> to vector<8x1xf32>
    %55 = tpu.reciprocal %54 {approx = true} : vector<8x1xf32> -> vector<8x1xf32>
    %56 = vector.broadcast %55 : vector<8x1xf32> to vector<8x8xf32>
    %57 = arith.mulf %52, %56 : vector<8x8xf32>
    %58 = arith.truncf %57 : vector<8x8xf32> to vector<8x8xbf16>
    %cst_14 = arith.constant dense<0.000000e+00> : vector<8x16xf32>
    %59 = tpu.matmul %58, %46, %cst_14 {dimension_numbers = #tpu.dot_dimension_numbers<[1], [0], [0], [1], [0, 0, 1, 1], [], []>} : vector<8x8xbf16>, vector<8x16xbf16>, vector<8x16xf32> -> vector<8x16xf32>
    %60 = vector.extract_strided_slice %2 {offsets = [0, 48], sizes = [8, 16], strides = [1, 1]} : vector<16x192xf32> to vector<8x16xf32>
    %61 = arith.truncf %60 : vector<8x16xf32> to vector<8x16xbf16>
    %62 = vector.extract_strided_slice %2 {offsets = [0, 112], sizes = [8, 16], strides = [1, 1]} : vector<16x192xf32> to vector<8x16xf32>
    %63 = arith.truncf %62 : vector<8x16xf32> to vector<8x16xbf16>
    %64 = vector.extract_strided_slice %2 {offsets = [0, 176], sizes = [8, 16], strides = [1, 1]} : vector<16x192xf32> to vector<8x16xf32>
    %65 = arith.truncf %64 : vector<8x16xf32> to vector<8x16xbf16>
    %cst_15 = arith.constant dense<0.000000e+00> : vector<8x8xf32>
    %66 = tpu.matmul %61, %63, %cst_15 {dimension_numbers = #tpu.dot_dimension_numbers<[1], [1], [0], [0], [0, 0, 1, 0], [], []>} : vector<8x16xbf16>, vector<8x16xbf16>, vector<8x8xf32> -> vector<8x8xf32>
    %cst_16 = arith.constant dense<0xFF800000> : vector<8xf32>
    %67 = vector.multi_reduction <maximumf>, %66, %cst_16 [1] : vector<8x8xf32> to vector<8xf32>
    %68 = vector.shape_cast %67 : vector<8xf32> to vector<8x1xf32>
    %69 = vector.broadcast %68 : vector<8x1xf32> to vector<8x8xf32>
    %70 = arith.subf %66, %69 : vector<8x8xf32>
    %71 = math.exp %70 : vector<8x8xf32>
    %cst_17 = arith.constant dense<0.000000e+00> : vector<8xf32>
    %72 = vector.multi_reduction <add>, %71, %cst_17 [1] : vector<8x8xf32> to vector<8xf32>
    %73 = vector.shape_cast %72 : vector<8xf32> to vector<8x1xf32>
    %74 = tpu.reciprocal %73 {approx = true} : vector<8x1xf32> -> vector<8x1xf32>
    %75 = vector.broadcast %74 : vector<8x1xf32> to vector<8x8xf32>
    %76 = arith.mulf %71, %75 : vector<8x8xf32>
    %77 = arith.truncf %76 : vector<8x8xf32> to vector<8x8xbf16>
    %cst_18 = arith.constant dense<0.000000e+00> : vector<8x16xf32>
    %78 = tpu.matmul %77, %65, %cst_18 {dimension_numbers = #tpu.dot_dimension_numbers<[1], [0], [0], [1], [0, 0, 1, 1], [], []>} : vector<8x8xbf16>, vector<8x16xbf16>, vector<8x16xf32> -> vector<8x16xf32>
    %79 = tpu.concatenate %21, %40, %59, %78 in 1 : vector<8x16xf32>, vector<8x16xf32>, vector<8x16xf32>, vector<8x16xf32> -> vector<8x64xf32>
    %80 = vector.extract_strided_slice %2 {offsets = [8, 0], sizes = [8, 16], strides = [1, 1]} : vector<16x192xf32> to vector<8x16xf32>
    %81 = arith.truncf %80 : vector<8x16xf32> to vector<8x16xbf16>
    %82 = vector.extract_strided_slice %2 {offsets = [8, 64], sizes = [8, 16], strides = [1, 1]} : vector<16x192xf32> to vector<8x16xf32>
    %83 = arith.truncf %82 : vector<8x16xf32> to vector<8x16xbf16>
    %84 = vector.extract_strided_slice %2 {offsets = [8, 128], sizes = [8, 16], strides = [1, 1]} : vector<16x192xf32> to vector<8x16xf32>
    %85 = arith.truncf %84 : vector<8x16xf32> to vector<8x16xbf16>
    %cst_19 = arith.constant dense<0.000000e+00> : vector<8x8xf32>
    %86 = tpu.matmul %81, %83, %cst_19 {dimension_numbers = #tpu.dot_dimension_numbers<[1], [1], [0], [0], [0, 0, 1, 0], [], []>} : vector<8x16xbf16>, vector<8x16xbf16>, vector<8x8xf32> -> vector<8x8xf32>
    %cst_20 = arith.constant dense<0xFF800000> : vector<8xf32>
    %87 = vector.multi_reduction <maximumf>, %86, %cst_20 [1] : vector<8x8xf32> to vector<8xf32>
    %88 = vector.shape_cast %87 : vector<8xf32> to vector<8x1xf32>
    %89 = vector.broadcast %88 : vector<8x1xf32> to vector<8x8xf32>
    %90 = arith.subf %86, %89 : vector<8x8xf32>
    %91 = math.exp %90 : vector<8x8xf32>
    %cst_21 = arith.constant dense<0.000000e+00> : vector<8xf32>
    %92 = vector.multi_reduction <add>, %91, %cst_21 [1] : vector<8x8xf32> to vector<8xf32>
    %93 = vector.shape_cast %92 : vector<8xf32> to vector<8x1xf32>
    %94 = tpu.reciprocal %93 {approx = true} : vector<8x1xf32> -> vector<8x1xf32>
    %95 = vector.broadcast %94 : vector<8x1xf32> to vector<8x8xf32>
    %96 = arith.mulf %91, %95 : vector<8x8xf32>
    %97 = arith.truncf %96 : vector<8x8xf32> to vector<8x8xbf16>
    %cst_22 = arith.constant dense<0.000000e+00> : vector<8x16xf32>
    %98 = tpu.matmul %97, %85, %cst_22 {dimension_numbers = #tpu.dot_dimension_numbers<[1], [0], [0], [1], [0, 0, 1, 1], [], []>} : vector<8x8xbf16>, vector<8x16xbf16>, vector<8x16xf32> -> vector<8x16xf32>
    %99 = vector.extract_strided_slice %2 {offsets = [8, 16], sizes = [8, 16], strides = [1, 1]} : vector<16x192xf32> to vector<8x16xf32>
    %100 = arith.truncf %99 : vector<8x16xf32> to vector<8x16xbf16>
    %101 = vector.extract_strided_slice %2 {offsets = [8, 80], sizes = [8, 16], strides = [1, 1]} : vector<16x192xf32> to vector<8x16xf32>
    %102 = arith.truncf %101 : vector<8x16xf32> to vector<8x16xbf16>
    %103 = vector.extract_strided_slice %2 {offsets = [8, 144], sizes = [8, 16], strides = [1, 1]} : vector<16x192xf32> to vector<8x16xf32>
    %104 = arith.truncf %103 : vector<8x16xf32> to vector<8x16xbf16>
    %cst_23 = arith.constant dense<0.000000e+00> : vector<8x8xf32>
    %105 = tpu.matmul %100, %102, %cst_23 {dimension_numbers = #tpu.dot_dimension_numbers<[1], [1], [0], [0], [0, 0, 1, 0], [], []>} : vector<8x16xbf16>, vector<8x16xbf16>, vector<8x8xf32> -> vector<8x8xf32>
    %cst_24 = arith.constant dense<0xFF800000> : vector<8xf32>
    %106 = vector.multi_reduction <maximumf>, %105, %cst_24 [1] : vector<8x8xf32> to vector<8xf32>
    %107 = vector.shape_cast %106 : vector<8xf32> to vector<8x1xf32>
    %108 = vector.broadcast %107 : vector<8x1xf32> to vector<8x8xf32>
    %109 = arith.subf %105, %108 : vector<8x8xf32>
    %110 = math.exp %109 : vector<8x8xf32>
    %cst_25 = arith.constant dense<0.000000e+00> : vector<8xf32>
    %111 = vector.multi_reduction <add>, %110, %cst_25 [1] : vector<8x8xf32> to vector<8xf32>
    %112 = vector.shape_cast %111 : vector<8xf32> to vector<8x1xf32>
    %113 = tpu.reciprocal %112 {approx = true} : vector<8x1xf32> -> vector<8x1xf32>
    %114 = vector.broadcast %113 : vector<8x1xf32> to vector<8x8xf32>
    %115 = arith.mulf %110, %114 : vector<8x8xf32>
    %116 = arith.truncf %115 : vector<8x8xf32> to vector<8x8xbf16>
    %cst_26 = arith.constant dense<0.000000e+00> : vector<8x16xf32>
    %117 = tpu.matmul %116, %104, %cst_26 {dimension_numbers = #tpu.dot_dimension_numbers<[1], [0], [0], [1], [0, 0, 1, 1], [], []>} : vector<8x8xbf16>, vector<8x16xbf16>, vector<8x16xf32> -> vector<8x16xf32>
    %118 = vector.extract_strided_slice %2 {offsets = [8, 32], sizes = [8, 16], strides = [1, 1]} : vector<16x192xf32> to vector<8x16xf32>
    %119 = arith.truncf %118 : vector<8x16xf32> to vector<8x16xbf16>
    %120 = vector.extract_strided_slice %2 {offsets = [8, 96], sizes = [8, 16], strides = [1, 1]} : vector<16x192xf32> to vector<8x16xf32>
    %121 = arith.truncf %120 : vector<8x16xf32> to vector<8x16xbf16>
    %122 = vector.extract_strided_slice %2 {offsets = [8, 160], sizes = [8, 16], strides = [1, 1]} : vector<16x192xf32> to vector<8x16xf32>
    %123 = arith.truncf %122 : vector<8x16xf32> to vector<8x16xbf16>
    %cst_27 = arith.constant dense<0.000000e+00> : vector<8x8xf32>
    %124 = tpu.matmul %119, %121, %cst_27 {dimension_numbers = #tpu.dot_dimension_numbers<[1], [1], [0], [0], [0, 0, 1, 0], [], []>} : vector<8x16xbf16>, vector<8x16xbf16>, vector<8x8xf32> -> vector<8x8xf32>
    %cst_28 = arith.constant dense<0xFF800000> : vector<8xf32>
    %125 = vector.multi_reduction <maximumf>, %124, %cst_28 [1] : vector<8x8xf32> to vector<8xf32>
    %126 = vector.shape_cast %125 : vector<8xf32> to vector<8x1xf32>
    %127 = vector.broadcast %126 : vector<8x1xf32> to vector<8x8xf32>
    %128 = arith.subf %124, %127 : vector<8x8xf32>
    %129 = math.exp %128 : vector<8x8xf32>
    %cst_29 = arith.constant dense<0.000000e+00> : vector<8xf32>
    %130 = vector.multi_reduction <add>, %129, %cst_29 [1] : vector<8x8xf32> to vector<8xf32>
    %131 = vector.shape_cast %130 : vector<8xf32> to vector<8x1xf32>
    %132 = tpu.reciprocal %131 {approx = true} : vector<8x1xf32> -> vector<8x1xf32>
    %133 = vector.broadcast %132 : vector<8x1xf32> to vector<8x8xf32>
    %134 = arith.mulf %129, %133 : vector<8x8xf32>
    %135 = arith.truncf %134 : vector<8x8xf32> to vector<8x8xbf16>
    %cst_30 = arith.constant dense<0.000000e+00> : vector<8x16xf32>
    %136 = tpu.matmul %135, %123, %cst_30 {dimension_numbers = #tpu.dot_dimension_numbers<[1], [0], [0], [1], [0, 0, 1, 1], [], []>} : vector<8x8xbf16>, vector<8x16xbf16>, vector<8x16xf32> -> vector<8x16xf32>
    %137 = vector.extract_strided_slice %2 {offsets = [8, 48], sizes = [8, 16], strides = [1, 1]} : vector<16x192xf32> to vector<8x16xf32>
    %138 = arith.truncf %137 : vector<8x16xf32> to vector<8x16xbf16>
    %139 = vector.extract_strided_slice %2 {offsets = [8, 112], sizes = [8, 16], strides = [1, 1]} : vector<16x192xf32> to vector<8x16xf32>
    %140 = arith.truncf %139 : vector<8x16xf32> to vector<8x16xbf16>
    %141 = vector.extract_strided_slice %2 {offsets = [8, 176], sizes = [8, 16], strides = [1, 1]} : vector<16x192xf32> to vector<8x16xf32>
    %142 = arith.truncf %141 : vector<8x16xf32> to vector<8x16xbf16>
    %cst_31 = arith.constant dense<0.000000e+00> : vector<8x8xf32>
    %143 = tpu.matmul %138, %140, %cst_31 {dimension_numbers = #tpu.dot_dimension_numbers<[1], [1], [0], [0], [0, 0, 1, 0], [], []>} : vector<8x16xbf16>, vector<8x16xbf16>, vector<8x8xf32> -> vector<8x8xf32>
    %cst_32 = arith.constant dense<0xFF800000> : vector<8xf32>
    %144 = vector.multi_reduction <maximumf>, %143, %cst_32 [1] : vector<8x8xf32> to vector<8xf32>
    %145 = vector.shape_cast %144 : vector<8xf32> to vector<8x1xf32>
    %146 = vector.broadcast %145 : vector<8x1xf32> to vector<8x8xf32>
    %147 = arith.subf %143, %146 : vector<8x8xf32>
    %148 = math.exp %147 : vector<8x8xf32>
    %cst_33 = arith.constant dense<0.000000e+00> : vector<8xf32>
    %149 = vector.multi_reduction <add>, %148, %cst_33 [1] : vector<8x8xf32> to vector<8xf32>
    %150 = vector.shape_cast %149 : vector<8xf32> to vector<8x1xf32>
    %151 = tpu.reciprocal %150 {approx = true} : vector<8x1xf32> -> vector<8x1xf32>
    %152 = vector.broadcast %151 : vector<8x1xf32> to vector<8x8xf32>
    %153 = arith.mulf %148, %152 : vector<8x8xf32>
    %154 = arith.truncf %153 : vector<8x8xf32> to vector<8x8xbf16>
    %cst_34 = arith.constant dense<0.000000e+00> : vector<8x16xf32>
    %155 = tpu.matmul %154, %142, %cst_34 {dimension_numbers = #tpu.dot_dimension_numbers<[1], [0], [0], [1], [0, 0, 1, 1], [], []>} : vector<8x8xbf16>, vector<8x16xbf16>, vector<8x16xf32> -> vector<8x16xf32>
    %156 = tpu.concatenate %98, %117, %136, %155 in 1 : vector<8x16xf32>, vector<8x16xf32>, vector<8x16xf32>, vector<8x16xf32> -> vector<8x64xf32>
    %157 = tpu.concatenate %79, %156 in 0 : vector<8x64xf32>, vector<8x64xf32> -> vector<16x64xf32>
    %158 = arith.truncf %157 : vector<16x64xf32> to vector<16x64xbf16>
    %c0_35 = arith.constant 0 : index
    %c0_36 = arith.constant 0 : index
    %159 = vector.load %arg3[%c0_35, %c0_36] : memref<64x32xbf16, #tpu.memory_space<vmem>>, vector<64x32xbf16>
    %cst_37 = arith.constant dense<0.000000e+00> : vector<16x32xf32>
    %160 = tpu.matmul %158, %159, %cst_37 {dimension_numbers = #tpu.dot_dimension_numbers<[1], [0], [0], [1], [0, 0, 1, 1], [], []>} : vector<16x64xbf16>, vector<64x32xbf16>, vector<16x32xf32> -> vector<16x32xf32>
    %c0_38 = arith.constant 0 : index
    %c0_39 = arith.constant 0 : index
    %161 = vector.load %arg4[%c0_38, %c0_39] : memref<1x32xf32, #tpu.memory_space<vmem>>, vector<1x32xf32>
    %162 = vector.broadcast %161 : vector<1x32xf32> to vector<16x32xf32>
    %163 = arith.addf %160, %162 : vector<16x32xf32>
    %c0_40 = arith.constant 0 : index
    %c0_41 = arith.constant 0 : index
    %164 = vector.load %arg5[%c0_40, %c0_41] : memref<16x32xf32, #tpu.memory_space<vmem>>, vector<16x32xf32>
    tpu.vector_store %arg5[%c0_40, %c0_41], %163 {strides = array<i32>} : memref<16x32xf32, #tpu.memory_space<vmem>>, vector<16x32xf32>,
    return
  }
  func.func @transform_0(%arg0: i32) -> (i32, i32) {
    %c0_i32 = arith.constant 0 : i32
    %c0_i32_0 = arith.constant 0 : i32
    %c0_i32_1 = arith.constant 0 : i32
    return %c0_i32, %c0_i32_0 : i32, i32
  }
  func.func @transform_1(%arg0: i32) -> (i32, i32) {
    %c0_i32 = arith.constant 0 : i32
    %c0_i32_0 = arith.constant 0 : i32
    %c0_i32_1 = arith.constant 0 : i32
    return %c0_i32, %c0_i32_0 : i32, i32
  }
  func.func @transform_2(%arg0: i32) -> (i32, i32) {
    %c0_i32 = arith.constant 0 : i32
    %c0_i32_0 = arith.constant 0 : i32
    %c0_i32_1 = arith.constant 0 : i32
    return %c0_i32, %c0_i32_0 : i32, i32
  }
  func.func @transform_3(%arg0: i32) -> (i32, i32) {
    %c0_i32 = arith.constant 0 : i32
    %c0_i32_0 = arith.constant 0 : i32
    %c0_i32_1 = arith.constant 0 : i32
    return %c0_i32, %c0_i32_0 : i32, i32
  }
  func.func @transform_4(%arg0: i32) -> (i32, i32) {
    %c0_i32 = arith.constant 0 : i32
    %c0_i32_0 = arith.constant 0 : i32
    %c0_i32_1 = arith.constant 0 : i32
    return %c0_i32, %c0_i32_0 : i32, i32
  }
}

</mosaic_0001>

<bundles_post_ra>
// kernel: tpu_custom_call.1
= control target key start
LH: loop header
LB: loop body
LE: loop exit
PB: predicated region body
PF: predicated region fallthrough
CT: control target
= control target key end

     0   :  { %v1380_v2 = vmov 0   ;;  %s1611_s0 = inlined_call_operand.vmem [shape: bf16[16,32], index: 0, kind: input, shape index: {}]   ;;  %s1612_s1 = inlined_call_operand.vmem [shape: bf16[32,192], index: 1, kind: input, shape index: {}]   ;;  %s1613_s2 = inlined_call_operand.vmem [shape: bf16[64,32], index: 2, kind: input, shape index: {}]   ;;  %s1614_s3 = inlined_call_operand.vmem [shape: f32[1,32], index: 3, kind: input, shape index: {}]   ;;  %s1615_s4 = inlined_call_operand.hbm [shape: f32[16,32], index: 4, kind: output, shape index: {}]  }
   0x1   :  { %v1315_v0 = vld [vmem:[%s1612_s1 + $0x14] ss:$8 sps:$4 sm:$0xff]   ;;  %v1317_v1 = vld [vmem:[%s1612_s1 + $0x10] ss:$8 sps:$4 sm:$0xff]   ;;  %86 = vmatprep.mubr.bf16.mxu0 %v1380_v2  ;;  %v1318_v3 = vld [vmem:[%s1612_s1 + $0x4] ss:$8 sps:$4 sm:$0xff]  }
   0x2   :  { %66 = vmatprep.subr.bf16.mxu0 %v1315_v0  ;;  %v1320_v4 = vld [vmem:[%s1612_s1] ss:$8 sps:$4 sm:$0xff]  }
   0x3   :  { %67 = vmatpush1.bf16.msra.mxu0 %v1317_v1  ;;  %v1321_v5 = vld [vmem:[%s1611_s0] sm:$0xff]  }
   0x4   :  { %68 = vmatprep.subr.bf16.mxu0 %v1318_v3 }
   0x5   :  { %9 = vsyncpa [#allocation3], 0  ;;  %vm50_vm0 = vcmask 261120   ;;  %v1381_v6 = vmov 0.0   ;;  %vm1382_vm1 = vmmov 0   ;;  %vm165_vm2 = vcmask 1043456  }
   0x6   :  { %1179 = vmatprep.subr.bf16.mxu1 %v1381_v6  ;;  %1181 = vmatprep.mubr.msk.bf16.mxu1 %vm1382_vm1, %v1381_v6  ;;  %s1383_s0 = smov 112   ;;  %s1384_s1 = smov 64   ;;  %vm102_vm3 = vcmask 130048   ;;  %vm149_vm4 = vcmask 64512   ;;  %vm554_vm5 = vcmask 392192   ;;  %vm1051_vm6 = vcmask 523264  }
   0x7   :  { %69 = vmatpush1.bf16.msra.mxu0 %v1320_v4  ;;  %s1385_s25 = smov 32   ;;  %s1386_s26 = smov 48  }
   0x8   :  { %1185 = vmatprep.subr.bf16.mxu0 %v1381_v6  ;;  %s1387_s27 = smov 16   ;;  %s1388_s28 = smov 96  }
   0x9   :  { %s1389_s29 = smov 80   ;;  %s1390_s13 = smov [#allocation2]  }
   0xa   :  { %1119 = vmatmul.mubr.msk.bf16.vlgmr.msra.gmra.mxu0 %vm50_vm0, %v1321_v5  ;;  %s1103_s14 = sshll.u32 %s1390_s13, 4  ;;  %s1104_s14 = int_to_ptr.vmem [resolvable:$true] %s1103_s14 }
   0xb   :  { %1187 = vmatprep.mubr.msk.bf16.mxu0 %vm1382_vm1, %v1381_v6  ;;  %s1358_s15 = scalar_lea.vmem %s1104_s14, 256  ;;  %p1363_p1 = scmp.lt.s32.totalorder %s1104_s14, %s1104_s14 }
   0xc   :  { %p1359_p0 = scmp.ne.s32.totalorder %s1104_s14, %s1358_s15  ;;  %p1364_p2 = scmp.lt.s32.totalorder %s1358_s15, %s1358_s15 }
   0xe   :  { %p1365_p3 = por %p1364_p2, %p1363_p1 }
  0x10   :  { %p1366_p4 = pnand %p1365_p3, %p1359_p0 }
  0xca   :  { %v88_v7 = vpop.f32.mrf.mxu0 }
  0xcb   :  { %v97_v8 = vpack.c.bf16 %v88_v7, %v88_v7 }
  0xcc   :  { %v90_v9 = vpop.f32.mrf.mxu0 }
  0xcd   :  { %v1440_v10 = vpack.c.bf16 %v90_v9, %v90_v9  ;;  %209 = vrot.lane.b32.xlu1 %v97_v8, %s1383_s0  ;;  %100 = vrot.lane.b32.xlu0 %v97_v8, %s1384_s1 }
  0xce   :  { %v92_v12 = vpop.f32.mrf.mxu0 }
  0xcf   :  { %v167_v11 = vsel %vm165_vm2, %v1440_v10, 0  ;;  %v556_v13 = vpack.c.bf16 %v92_v12, %v92_v12 }
  0xd0   :  { %1186 = vmatpush3.bf16.msra.mxu0 %v167_v11 }
  0xd1   :  { %322 = vrot.lane.b32.xlu1 %v97_v8, %s1385_s25  ;;  %211 = vrot.lane.b32.xlu0 %v97_v8, %s1386_s26 }
  0xd2   :  { %1197 = vmatprep.subr.bf16.mxu0 %v1381_v6 }
  0xd5   :  { %432 = vrot.lane.b32.xlu1 %v97_v8, %s1387_s27  ;;  %320 = vrot.lane.b32.xlu0 %v97_v8, %s1388_s28 }
  0xd9   :  { %430 = vrot.lane.b32.xlu0 %v97_v8, %s1389_s29  ;;  %559 = vrot.lane.b32.xlu1 %v556_v13, %s1384_s1 }
  0xdd   :  { %667 = vrot.lane.b32.xlu0 %v556_v13, %s1386_s26  ;;  %665 = vrot.lane.b32.xlu1 %v556_v13, %s1383_s0 }
  0xe1   :  { %778 = vrot.lane.b32.xlu0 %v556_v13, %s1385_s25  ;;  %776 = vrot.lane.b32.xlu1 %v556_v13, %s1388_s28 }
  0xe5   :  { %888 = vrot.lane.b32.xlu0 %v556_v13, %s1387_s27  ;;  %886 = vrot.lane.b32.xlu1 %v556_v13, %s1389_s29 }
 0x13f   :  { %v101_v14 = vpop.permute.xlu0 %100  ;;  %v210_v17 = vpop.permute.xlu1 %209 }
 0x140   :  { %v107_v15 = vsel %vm102_vm3, %v101_v14, 0 }
 0x141   :  { %1180 = vmatpush3.bf16.xpose.msra.mxu1 %v107_v15 }
 0x142   :  { %1191 = vmatprep.subr.bf16.mxu1 %v1381_v6 }
 0x143   :  { %v212_v16 = vpop.permute.xlu0 %211  ;;  %v323_v19 = vpop.permute.xlu1 %322 }
 0x144   :  { %v217_v18 = vsel %vm102_vm3, %v212_v16, 0  ;;  %v328_v20 = vsel %vm102_vm3, %v323_v19, 0 }
 0x147   :  { %v433_v21 = vpop.permute.xlu1 %432  ;;  %v321_v22 = vpop.permute.xlu0 %320 }
 0x148   :  { %1182 = vmatmul.mubr.msk.bf16.vlgmr.msra.gmra.mxu1 %vm102_vm3, %v97_v8  ;;  %v438_v23 = vsel %vm102_vm3, %v433_v21, 0 }
 0x149   :  { %1192 = vmatpush3.bf16.xpose.msra.mxu1 %v217_v18  ;;  %1193 = vmatprep.mubr.msk.bf16.mxu1 %vm1382_vm1, %v1381_v6 }
 0x14a   :  { %1203 = vmatprep.subr.bf16.mxu1 %v1381_v6 }
 0x14b   :  { %v560_v24 = vpop.permute.xlu1 %559  ;;  %v431_v25 = vpop.permute.xlu0 %430 }
 0x14c   :  { %v565_v26 = vsel %vm102_vm3, %v560_v24, 0 }
 0x14f   :  { %v668_v27 = vpop.permute.xlu0 %667  ;;  %v666_v30 = vpop.permute.xlu1 %665 }
 0x150   :  { %1194 = vmatmul.mubr.msk.bf16.vlgmr.msra.gmra.mxu1 %vm102_vm3, %v210_v17  ;;  %v673_v28 = vsel %vm102_vm3, %v668_v27, 0 }
 0x151   :  { %1204 = vmatpush3.bf16.xpose.msra.mxu1 %v328_v20  ;;  %1205 = vmatprep.mubr.msk.bf16.mxu1 %vm1382_vm1, %v1381_v6 }
 0x152   :  { %1215 = vmatprep.subr.bf16.mxu1 %v1381_v6 }
 0x153   :  { %v779_v29 = vpop.permute.xlu0 %778  ;;  %v777_v33 = vpop.permute.xlu1 %776 }
 0x154   :  { %v784_v31 = vsel %vm102_vm3, %v779_v29, 0 }
 0x157   :  { %v889_v32 = vpop.permute.xlu0 %888  ;;  %v887_v35 = vpop.permute.xlu1 %886 }
 0x158   :  { %1206 = vmatmul.mubr.msk.bf16.vlgmr.msra.gmra.mxu1 %vm102_vm3, %v321_v22  ;;  %v894_v34 = vsel %vm102_vm3, %v889_v32, 0 }
 0x159   :  { %1216 = vmatpush3.bf16.xpose.msra.mxu1 %v438_v23  ;;  %1217 = vmatprep.mubr.msk.bf16.mxu1 %vm1382_vm1, %v1381_v6 }
 0x15a   :  { %1227 = vmatprep.subr.bf16.mxu1 %v1381_v6 }
 0x160   :  { %1218 = vmatmul.mubr.msk.bf16.vlgmr.msra.gmra.mxu1 %vm102_vm3, %v431_v25 }
 0x161   :  { %1228 = vmatpush3.bf16.xpose.msra.mxu1 %v565_v26  ;;  %1229 = vmatprep.mubr.msk.bf16.mxu1 %vm1382_vm1, %v1381_v6 }
 0x162   :  { %1239 = vmatprep.subr.bf16.mxu1 %v1381_v6 }
 0x168   :  { %1230 = vmatmul.mubr.msk.bf16.vlgmr.msra.gmra.mxu1 %vm102_vm3, %v556_v13 }
 0x169   :  { %1240 = vmatpush3.bf16.xpose.msra.mxu1 %v673_v28  ;;  %1241 = vmatprep.mubr.msk.bf16.mxu1 %vm1382_vm1, %v1381_v6 }
 0x16a   :  { %1251 = vmatprep.subr.bf16.mxu1 %v1381_v6 }
 0x170   :  { %1242 = vmatmul.mubr.msk.bf16.vlgmr.msra.gmra.mxu1 %vm102_vm3, %v666_v30 }
 0x171   :  { %1252 = vmatpush3.bf16.xpose.msra.mxu1 %v784_v31  ;;  %1253 = vmatprep.mubr.msk.bf16.mxu1 %vm1382_vm1, %v1381_v6 }
 0x172   :  { %1263 = vmatprep.subr.bf16.mxu1 %v1381_v6 }
 0x178   :  { %1254 = vmatmul.mubr.msk.bf16.vlgmr.msra.gmra.mxu1 %vm102_vm3, %v777_v33 }
 0x179   :  { %1264 = vmatpush3.bf16.xpose.msra.mxu1 %v894_v34  ;;  %1265 = vmatprep.mubr.msk.bf16.mxu1 %vm1382_vm1, %v1381_v6 }
 0x17a   :  { %1275 = vmatprep.subr.bf16.mxu1 %v1381_v6 }
 0x180   :  { %1266 = vmatmul.mubr.msk.bf16.vlgmr.msra.gmra.mxu1 %vm102_vm3, %v887_v35 }
 0x181   :  { %1283 = vmatprep.mubr.msk.bf16.mxu1 %vm1382_vm1, %v1381_v6 }
 0x208   :  { %v143_v36 = vpop.f32.mrf.mxu1 }
 0x209   :  { %v150_v37 = vsel %vm149_vm4, %v143_v36, -inf }
 0x20a   :  { %v1183_v38 = vpop.f32.mrf.mxu1  ;;  %151 = vmax.xlane.f32.xlu0 %v150_v37 }
 0x20c   :  { %v146_v39 = vpop.f32.mrf.mxu1 }
 0x20e   :  { %v1184_v40 = vpop.f32.mrf.mxu1 }
 0x210   :  { %v253_v41 = vpop.f32.mrf.mxu1 }
 0x211   :  { %v259_v42 = vsel %vm149_vm4, %v253_v41, -inf }
 0x212   :  { %v1195_v43 = vpop.f32.mrf.mxu1  ;;  %260 = vmax.xlane.f32.xlu1 %v259_v42 }
 0x214   :  { %v256_v44 = vpop.f32.mrf.mxu1 }
 0x216   :  { %v1196_v45 = vpop.f32.mrf.mxu1 }
 0x218   :  { %v364_v46 = vpop.f32.mrf.mxu1 }
 0x219   :  { %v370_v47 = vsel %vm149_vm4, %v364_v46, -inf }
 0x21a   :  { %v1207_v48 = vpop.f32.mrf.mxu1  ;;  %371 = vmax.xlane.f32.xlu0 %v370_v47 }
 0x21c   :  { %v367_v49 = vpop.f32.mrf.mxu1 }
 0x21e   :  { %v1208_v50 = vpop.f32.mrf.mxu1 }
 0x220   :  { %v474_v51 = vpop.f32.mrf.mxu1 }
 0x221   :  { %v480_v52 = vsel %vm149_vm4, %v474_v51, -inf }
 0x222   :  { %v1219_v53 = vpop.f32.mrf.mxu1  ;;  %481 = vmax.xlane.f32.xlu0 %v480_v52 }
 0x223   :  { %v94_v53 = vpop.f32.mrf.mxu0 }
 0x224   :  { %v477_v54 = vpop.f32.mrf.mxu1 }
 0x225   :  { %v557_v54 = vpack.c.bf16 %v94_v53, %v94_v53 }
 0x226   :  { %v1220_v55 = vpop.f32.mrf.mxu1 }
 0x228   :  { %v601_v56 = vpop.f32.mrf.mxu1 }
 0x229   :  { %v607_v57 = vsel %vm149_vm4, %v601_v56, -inf }
 0x22a   :  { %608 = vmax.xlane.f32.xlu1 %v607_v57  ;;  %v1231_v58 = vpop.f32.mrf.mxu1 }
 0x22c   :  { %v604_v59 = vpop.f32.mrf.mxu1 }
 0x22e   :  { %v1232_v60 = vpop.f32.mrf.mxu1 }
 0x230   :  { %v709_v61 = vpop.f32.mrf.mxu1 }
 0x231   :  { %v715_v62 = vsel %vm149_vm4, %v709_v61, -inf }
 0x232   :  { %716 = vmax.xlane.f32.xlu0 %v715_v62  ;;  %v1243_v63 = vpop.f32.mrf.mxu1 }
 0x234   :  { %v712_v0 = vpop.f32.mrf.mxu1 }
 0x236   :  { %v1244_v1 = vpop.f32.mrf.mxu1 }
 0x238   :  { %v820_v2 = vpop.f32.mrf.mxu1 }
 0x239   :  { %v826_v3 = vsel %vm149_vm4, %v820_v2, -inf }
 0x23a   :  { %827 = vmax.xlane.f32.xlu1 %v826_v3  ;;  %v1255_v4 = vpop.f32.mrf.mxu1 }
 0x23c   :  { %v823_v5 = vpop.f32.mrf.mxu1 }
 0x23e   :  { %v1256_v7 = vpop.f32.mrf.mxu1 }
 0x240   :  { %v930_v8 = vpop.f32.mrf.mxu1 }
 0x241   :  { %v936_v9 = vsel %vm149_vm4, %v930_v8, -inf }
 0x242   :  { %937 = vmax.xlane.f32.xlu0 %v936_v9  ;;  %v1267_v11 = vpop.f32.mrf.mxu1 }
 0x244   :  { %v933_v12 = vpop.f32.mrf.mxu1 }
 0x246   :  { %v1268_v13 = vpop.f32.mrf.mxu1 }
 0x293   :  { %v152_v14 = vpop.xlane.xlu0 %151 }
 0x294   :  { %v153_v15 = vsub.f32 %v143_v36, %v152_v14 }
 0x296   :  { %v154_v16 = vmul.f32 1.442695, %v153_v15  ;;  %v623_v15 = vsel %vm165_vm2, %v557_v54, 0 }
 0x298   :  { %1326 = vpow2.f32 %v154_v16 }
 0x29b   :  { %v261_v17 = vpop.xlane.xlu1 %260 }
 0x29c   :  { %v262_v18 = vsub.f32 %v253_v41, %v261_v17 }
 0x29e   :  { %v263_v19 = vmul.f32 1.442695, %v262_v18 }
 0x2a0   :  { %1328 = vpow2.f32 %v263_v19 }
 0x2a3   :  { %v372_v20 = vpop.xlane.xlu0 %371 }
 0x2a4   :  { %v373_v21 = vsub.f32 %v364_v46, %v372_v20 }
 0x2a5   :  { %v1327_v22 = vpop.eup %1326 }
 0x2a6   :  { %v374_v23 = vmul.f32 1.442695, %v373_v21  ;;  %v156_v24 = vsel %vm149_vm4, %v1327_v22, 0.0 }
 0x2a7   :  { %157 = vadd.xlane.f32.xlu1 %v156_v24 }
 0x2a8   :  { %1330 = vpow2.f32 %v374_v23 }
 0x2ab   :  { %v482_v25 = vpop.xlane.xlu0 %481 }
 0x2ac   :  { %v483_v26 = vsub.f32 %v474_v51, %v482_v25 }
 0x2ad   :  { %v1329_v27 = vpop.eup %1328 }
 0x2ae   :  { %v484_v28 = vmul.f32 1.442695, %v483_v26  ;;  %v265_v29 = vsel %vm149_vm4, %v1329_v27, 0.0 }
 0x2af   :  { %266 = vadd.xlane.f32.xlu0 %v265_v29 }
 0x2b0   :  { %1332 = vpow2.f32 %v484_v28 }
 0x2b3   :  { %v609_v34 = vpop.xlane.xlu1 %608 }
 0x2b4   :  { %v610_v35 = vsub.f32 %v601_v56, %v609_v34 }
 0x2b5   :  { %v1507_v30 = vpop.eup %1330 }
 0x2b6   :  { %v376_v31 = vsel %vm149_vm4, %v1507_v30, 0.0  ;;  %v611_v39 = vmul.f32 1.442695, %v610_v35 }
 0x2b7   :  { %377 = vadd.xlane.f32.xlu1 %v376_v31 }
 0x2b8   :  { %1334 = vpow2.f32 %v611_v39 }
 0x2bb   :  { %v717_v36 = vpop.xlane.xlu0 %716 }
 0x2bc   :  { %v718_v38 = vsub.f32 %v709_v61, %v717_v36 }
 0x2bd   :  { %v1511_v32 = vpop.eup %1332 }
 0x2be   :  { %v486_v33 = vsel %vm149_vm4, %v1511_v32, 0.0  ;;  %v719_v42 = vmul.f32 1.442695, %v718_v38 }
 0x2bf   :  { %487 = vadd.xlane.f32.xlu0 %v486_v33 }
 0x2c0   :  { %1336 = vpow2.f32 %v719_v42 }
 0x2c3   :  { %v828_v37 = vpop.xlane.xlu1 %827 }
 0x2c4   :  { %v829_v40 = vsub.f32 %v820_v2, %v828_v37 }
 0x2c5   :  { %v1521_v46 = vpop.eup %1334 }
 0x2c6   :  { %v830_v43 = vmul.f32 1.442695, %v829_v40 }
 0x2c8   :  { %382 = vrot.lane.b32.xlu1 %v1440_v10, %s1388_s28  ;;  %1338 = vpow2.f32 %v830_v43 }
 0x2cb   :  { %v938_v41 = vpop.xlane.xlu0 %937 }
 0x2cc   :  { %492 = vrot.lane.b32.xlu1 %v1440_v10, %s1389_s29  ;;  %v939_v44 = vsub.f32 %v930_v8, %v938_v41 }
 0x2cd   :  { %v1523_v47 = vpop.eup %1336 }
 0x2ce   :  { %v940_v45 = vmul.f32 1.442695, %v939_v44  ;;  %v721_v49 = vsel %vm149_vm4, %v1523_v47, 0.0 }
 0x2d0   :  { %1340 = vpow2.f32 %v940_v45 }
 0x2d5   :  { %272 = vrot.lane.b32.xlu0 %v1440_v10, %s1383_s0  ;;  %v613_v10 = vsel %vm149_vm4, %v1521_v46, 0.0  ;;  %v1527_v48 = vpop.eup %1338 }
 0x2d6   :  { %v832_v50 = vsel %vm149_vm4, %v1527_v48, 0.0 }
 0x2dd   :  { %v1533_v51 = vpop.eup %1340 }
 0x2de   :  { %v942_v52 = vsel %vm149_vm4, %v1533_v51, 0.0 }
 0x2f0   :  { %614 = vadd.xlane.f32.xlu1 %v613_v10 }
 0x2f4   :  { %722 = vadd.xlane.f32.xlu1 %v721_v49  ;;  %833 = vadd.xlane.f32.xlu0 %v832_v50 }
 0x2f8   :  { %943 = vadd.xlane.f32.xlu1 %v942_v52 }
 0x309   :  { %838 = vrot.lane.b32.xlu1 %v557_v54, %s1388_s28 }
 0x30a   :  { %728 = vrot.lane.b32.xlu0 %v557_v54, %s1383_s0 }
 0x30e   :  { %948 = vrot.lane.b32.xlu0 %v557_v54, %s1389_s29  ;;  %v1322_v54 = vld [vmem:[%s1613_s2 + $0x18] sm:$0xff]  }
 0x30f   :  { %1276 = vmatpush3.bf16.msra.mxu1 %v1322_v54 }
 0x310   :  { %1277 = vmatprep.subr.bf16.mxu1 %v1381_v6 }
 0x330   :  { %v158_v55 = vpop.xlane.xlu1 %157 }
 0x331   :  { %1342 = vrcp.f32 %v158_v55 }
 0x338   :  { %v267_v56 = vpop.xlane.xlu0 %266 }
 0x339   :  { %1344 = vrcp.f32 %v267_v56 }
 0x33e   :  { %v1343_v57 = vpop.eup %1342 }
 0x33f   :  { %v160_v58 = vmul.f32 %v1343_v57, %v1327_v22 }
 0x340   :  { %v378_v59 = vpop.xlane.xlu1 %377 }
 0x341   :  { %v161_v60 = vpack.c.bf16 %v160_v58, %v160_v58  ;;  %1346 = vrcp.f32 %v378_v59  ;;  %v1323_v58 = vld [vmem:[%s1613_s2 + $0x10] sm:$0xff]  }
 0x342   :  { %1278 = vmatpush3.bf16.msra.mxu1 %v1323_v58 }
 0x343   :  { %1188 = vmatmul.mubr.msk.bf16.vlgmr.msra.gmra.mxu0 %vm149_vm4, %v161_v60  ;;  %1279 = vmatprep.subr.bf16.mxu1 %v1381_v6 }
 0x344   :  { %1199 = vmatprep.mubr.msk.bf16.mxu0 %vm1382_vm1, %v1381_v6  ;;  %v383_v2 = vpop.permute.xlu1 %382 }
 0x345   :  { %v388_v5 = vsel %vm165_vm2, %v383_v2, 0 }
 0x346   :  { %v1345_v61 = vpop.eup %1344 }
 0x347   :  { %v269_v63 = vmul.f32 %v1345_v61, %v1329_v27  ;;  %v1324_v61 = vld [vmem:[%s1613_s2 + $0x8] sm:$0xff]  }
 0x348   :  { %v488_v62 = vpop.xlane.xlu0 %487  ;;  %v493_v8 = vpop.permute.xlu1 %492  ;;  %1280 = vmatpush3.bf16.msra.mxu1 %v1324_v61 }
 0x349   :  { %1348 = vrcp.f32 %v488_v62  ;;  %v270_v3 = vpack.c.bf16 %v269_v63, %v269_v63  ;;  %v498_v12 = vsel %vm165_vm2, %v493_v8, 0  ;;  %1281 = vmatprep.subr.bf16.mxu1 %v1381_v6 }
 0x34c   :  { %v273_v0 = vpop.permute.xlu0 %272 }
 0x34d   :  { %v278_v1 = vsel %vm165_vm2, %v273_v0, 0 }
 0x34e   :  { %1198 = vmatpush3.bf16.msra.mxu0 %v278_v1  ;;  %v1347_v4 = vpop.eup %1346  ;;  %v1325_v1 = vld [vmem:[%s1613_s2] sm:$0xff]  }
 0x34f   :  { %1209 = vmatprep.subr.bf16.mxu0 %v1381_v6  ;;  %v380_v7 = vmul.f32 %v1347_v4, %v1507_v30  ;;  %1282 = vmatpush3.bf16.msra.mxu1 %v1325_v1 }
 0x351   :  { %1200 = vmatmul.mubr.msk.bf16.vlgmr.msra.gmra.mxu0 %vm149_vm4, %v270_v3  ;;  %v381_v9 = vpack.c.bf16 %v380_v7, %v380_v7 }
 0x352   :  { %1210 = vmatpush3.bf16.msra.mxu0 %v388_v5  ;;  %1211 = vmatprep.mubr.msk.bf16.mxu0 %vm1382_vm1, %v1381_v6 }
 0x353   :  { %1221 = vmatprep.subr.bf16.mxu0 %v1381_v6 }
 0x356   :  { %v1349_v11 = vpop.eup %1348 }
 0x357   :  { %v490_v13 = vmul.f32 %v1349_v11, %v1511_v32 }
 0x359   :  { %1212 = vmatmul.mubr.msk.bf16.vlgmr.msra.gmra.mxu0 %vm149_vm4, %v381_v9  ;;  %v491_v14 = vpack.c.bf16 %v490_v13, %v490_v13 }
 0x35a   :  { %1222 = vmatpush3.bf16.msra.mxu0 %v498_v12  ;;  %1223 = vmatprep.mubr.msk.bf16.mxu0 %vm1382_vm1, %v1381_v6 }
 0x35b   :  { %1233 = vmatprep.subr.bf16.mxu0 %v1381_v6 }
 0x361   :  { %1224 = vmatmul.mubr.msk.bf16.vlgmr.msra.gmra.mxu0 %vm149_vm4, %v491_v14 }
 0x362   :  { %1234 = vmatpush3.bf16.msra.mxu0 %v623_v15  ;;  %1235 = vmatprep.mubr.msk.bf16.mxu0 %vm1382_vm1, %v1381_v6 }
 0x363   :  { %1245 = vmatprep.subr.bf16.mxu0 %v1381_v6 }
 0x379   :  { %v615_v16 = vpop.xlane.xlu1 %614 }
 0x37a   :  { %1350 = vrcp.f32 %v615_v16 }
 0x37d   :  { %v723_v17 = vpop.xlane.xlu1 %722  ;;  %v834_v18 = vpop.xlane.xlu0 %833 }
 0x37e   :  { %1352 = vrcp.f32 %v723_v17 }
 0x37f   :  { %1354 = vrcp.f32 %v834_v18 }
 0x381   :  { %v729_v21 = vpop.permute.xlu0 %728  ;;  %v944_v23 = vpop.xlane.xlu1 %943 }
 0x382   :  { %v734_v25 = vsel %vm165_vm2, %v729_v21, 0  ;;  %1356 = vrcp.f32 %v944_v23 }
 0x385   :  { %v839_v27 = vpop.permute.xlu1 %838  ;;  %v949_v32 = vpop.permute.xlu0 %948 }
 0x386   :  { %v844_v30 = vsel %vm165_vm2, %v839_v27, 0  ;;  %v954_v35 = vsel %vm165_vm2, %v949_v32, 0 }
 0x387   :  { %v1351_v19 = vpop.eup %1350 }
 0x388   :  { %v617_v20 = vmul.f32 %v1351_v19, %v1521_v46 }
 0x38a   :  { %v618_v22 = vpack.c.bf16 %v617_v20, %v617_v20 }
 0x38b   :  { %v1353_v24 = vpop.eup %1352 }
 0x38c   :  { %1236 = vmatmul.mubr.msk.bf16.vlgmr.msra.gmra.mxu0 %vm149_vm4, %v618_v22  ;;  %v725_v26 = vmul.f32 %v1353_v24, %v1523_v47  ;;  %v1355_v29 = vpop.eup %1354 }
 0x38d   :  { %1246 = vmatpush3.bf16.msra.mxu0 %v734_v25  ;;  %1247 = vmatprep.mubr.msk.bf16.mxu0 %vm1382_vm1, %v1381_v6  ;;  %v836_v31 = vmul.f32 %v1355_v29, %v1527_v48  ;;  %v1136_v29 = vld [vmem:[%s1614_s3] ss:$0 sm:$0xff] }
 0x38e   :  { %1257 = vmatprep.subr.bf16.mxu0 %v1381_v6  ;;  %v726_v28 = vpack.c.bf16 %v725_v26, %v725_v26 }
 0x38f   :  { %v837_v33 = vpack.c.bf16 %v836_v31, %v836_v31  ;;  %v1357_v34 = vpop.eup %1356 }
 0x390   :  { %v946_v36 = vmul.f32 %v1357_v34, %v1533_v51 }
 0x392   :  { %v947_v37 = vpack.c.bf16 %v946_v36, %v946_v36 }
 0x394   :  { %1248 = vmatmul.mubr.msk.bf16.vlgmr.msra.gmra.mxu0 %vm149_vm4, %v726_v28 }
 0x395   :  { %1258 = vmatpush3.bf16.msra.mxu0 %v844_v30  ;;  %1259 = vmatprep.mubr.msk.bf16.mxu0 %vm1382_vm1, %v1381_v6 }
 0x396   :  { %1269 = vmatprep.subr.bf16.mxu0 %v1381_v6 }
 0x39c   :  { %1260 = vmatmul.mubr.msk.bf16.vlgmr.msra.gmra.mxu0 %vm149_vm4, %v837_v33 }
 0x39d   :  { %1270 = vmatpush3.bf16.msra.mxu0 %v954_v35  ;;  %1271 = vmatprep.mubr.msk.bf16.mxu0 %vm1382_vm1, %v1381_v6 }
 0x3a4   :  { %1272 = vmatmul.mubr.msk.bf16.vlgmr.msra.gmra.mxu0 %vm149_vm4, %v947_v37 }
 0x403   :  { %v203_v38 = vpop.f32.mrf.mxu0 }
 0x405   :  { %v1189_v39 = vpop.f32.mrf.mxu0 }
 0x407   :  { %v206_v40 = vpop.f32.mrf.mxu0 }
 0x409   :  { %v1190_v41 = vpop.f32.mrf.mxu0 }
 0x411   :  { %v314_v42 = vpop.f32.mrf.mxu0 }
 0x413   :  { %v1201_v43 = vpop.f32.mrf.mxu0 }
 0x415   :  { %v317_v44 = vpop.f32.mrf.mxu0 }
 0x417   :  { %v1202_v45 = vpop.f32.mrf.mxu0 }
 0x419   :  { %v424_v46 = vpop.f32.mrf.mxu0 }
 0x41b   :  { %v1213_v47 = vpop.f32.mrf.mxu0 }
 0x41d   :  { %v427_v10 = vpop.f32.mrf.mxu0 }
 0x41f   :  { %v1214_v48 = vpop.f32.mrf.mxu0 }
 0x421   :  { %v534_v49 = vpop.f32.mrf.mxu0 }
 0x423   :  { %v1225_v50 = vpop.f32.mrf.mxu0 }
 0x425   :  { %v537_v52 = vpop.f32.mrf.mxu0 }
 0x427   :  { %v1226_v53 = vpop.f32.mrf.mxu0 }
 0x44c   :  { %v659_v51 = vpop.f32.mrf.mxu0 }
 0x44e   :  { %v1237_v55 = vpop.f32.mrf.mxu0 }
 0x450   :  { %v662_v56 = vpop.f32.mrf.mxu0 }
 0x452   :  { %v1238_v57 = vpop.f32.mrf.mxu0 }
 0x454   :  { %v770_v59 = vpop.f32.mrf.mxu0 }
 0x455   :  { %v1300_v60 = vpack.i.bf16 %v770_v59, %v314_v42 }
 0x456   :  { %v1249_v62 = vpop.f32.mrf.mxu0 }
 0x457   :  { %1301 = vrot.lane.b32.xlu0 %v1300_v60, %s1387_s27 }
 0x458   :  { %v773_v63 = vpop.f32.mrf.mxu0 }
 0x45a   :  { %v1250_v0 = vpop.f32.mrf.mxu0 }
 0x45c   :  { %v880_v2 = vpop.f32.mrf.mxu0 }
 0x45d   :  { %v1305_v3 = vpack.i.bf16 %v880_v2, %v424_v46 }
 0x45e   :  { %v1261_v4 = vpop.f32.mrf.mxu0 }
 0x45f   :  { %1306 = vrot.lane.b32.xlu1 %v1305_v3, %s1385_s25 }
 0x460   :  { %v883_v5 = vpop.f32.mrf.mxu0 }
 0x462   :  { %v1262_v7 = vpop.f32.mrf.mxu0 }
 0x464   :  { %v990_v8 = vpop.f32.mrf.mxu0 }
 0x465   :  { %v1310_v9 = vpack.i.bf16 %v990_v8, %v534_v49 }
 0x466   :  { %v1273_v11 = vpop.f32.mrf.mxu0 }
 0x467   :  { %1311 = vrot.lane.b32.xlu0 %v1310_v9, %s1386_s26 }
 0x468   :  { %v993_v12 = vpop.f32.mrf.mxu0 }
 0x46a   :  { %v1274_v13 = vpop.f32.mrf.mxu0 }
 0x4c9   :  { %v1302_v6 = vpop.permute.xlu0 %1301 }
 0x4ca   :  { %v1304_v15 = vunpack.i.h.bf16 %v1302_v6  ;;  %v1303_v16 = vunpack.i.l.bf16 %v1302_v6 }
 0x4cc   :  { %v1008_v20 = vsel %vm102_vm3, %v659_v51, %v1304_v15  ;;  %v552_v21 = vsel %vm102_vm3, %v203_v38, %v1303_v16 }
 0x4d1   :  { %v1307_v14 = vpop.permute.xlu1 %1306 }
 0x4d2   :  { %v1309_v17 = vunpack.i.h.bf16 %v1307_v14  ;;  %v1308_v18 = vunpack.i.l.bf16 %v1307_v14 }
 0x4d4   :  { %v1009_v24 = vsel %vm50_vm0, %v1008_v20, %v1309_v17  ;;  %v553_v25 = vsel %vm50_vm0, %v552_v21, %v1308_v18 }
 0x4d9   :  { %v1312_v19 = vpop.permute.xlu0 %1311 }
 0x4da   :  { %v1314_v22 = vunpack.i.h.bf16 %v1312_v19  ;;  %v1313_v23 = vunpack.i.l.bf16 %v1312_v19 }
 0x4dc   :  { %v1010_v26 = vsel %vm554_vm5, %v1009_v24, %v1314_v22  ;;  %v555_v27 = vsel %vm554_vm5, %v553_v25, %v1313_v23 }
 0x4dd   :  { %v1011_v28 = vpack.c.bf16 %v1010_v26, %v555_v27 }
 0x4df   :  { %1284 = vmatmul.mubr.msk.bf16.vlgmr.msra.gmra.mxu1 %vm1051_vm6, %v1011_v28 }
 0x59f   :  { %v1089_v30 = vpop.f32.mrf.mxu1 }
 0x5a0   :  { %v1090_v31 = vadd.f32 %v1136_v29, %v1089_v30 }
 0x5a1   :  { %v1285_v32 = vpop.f32.mrf.mxu1 }
 0x5a2   :  { %1096 = vst.msk [vmem:[#allocation2] sm:$0xff] %vm50_vm0, %v1090_v31 }
 0x5a3   :  { %v1092_v33 = vpop.f32.mrf.mxu1 }
 0x5a4   :  { %v1093_v34 = vadd.f32 %v1136_v29, %v1092_v33 }
 0x5a5   :  { %v1286_v35 = vpop.f32.mrf.mxu1 }
 0x5a6   :  { %1097 = vst.msk [vmem:[#allocation2 + $0x8] sm:$0xff] %vm50_vm0, %v1093_v34 }
 0x5a7   :  { %1369 = shalt.err (!%p1366_p4)
}
 0x5a8   :  { %s1391_s3 = smov 128   ;;  %s1392_s16 = smov 8  }
 0x5a9   :  { %1109 = dma.vmem_to_hbm [thread:$0]  %s1104_s14, 256, %s1615_s4, [#allocation3], %s1391_s3, %s1391_s3, %s1392_s16  }
 0x5aa   :  { %1378 = dma.done.wait [#allocation3], 256  }
 0x5ab   :  { %1379 = vsyncadd [#allocation3], 4294967040 }
 0x5ac   :  { %1113 = vsyncpa [#allocation3], 1 }

</bundles_post_ra>
